<compile_context>
chip_gen: v5e
topology: v5e:2x2
jax: 0.10.0
libtpu: 0.0.40
codegen_flags: <defaults>
</compile_context>

<pallas_src>
import math

import jax
import jax.numpy as jnp
from jax.experimental import pallas as pl
from jax.experimental.pallas import tpu as pltpu


def _lambda_fn(x):
    # The "lambda" applied elementwise inside the kernel (identity here).
    return x


def _lambda_kernel(x_ref, o_ref):
    # Elementwise hot path: apply the lambda to the whole VMEM tile.
    # In/out dtypes are identical, so no cast is needed.
    o_ref[...] = _lambda_fn(x_ref[...])


# Lane-dense layout constants.
_LANES = 1024          # last dim: large multiple of 128 -> unmasked full-width stores
_MAX_TILE_ROWS = 512   # sublanes per block (multiple of 8) -> 2 MiB f32 block


def lambda_layer(x):
    """Apply LambdaLayer.forward(x) == lambd(x) via a Pallas TPU kernel.

    Accepts any array shape; the elementwise lambda is applied on a
    lane-dense (rows, 1024) view with multi-MiB blocks so the kernel runs at
    HBM bandwidth.
    """
    orig_shape = x.shape
    total = math.prod(orig_shape) if orig_shape else 1
    flat = x.reshape(-1)

    # Pad the flat element count up so it tiles exactly as (rows, _LANES)
    # with rows a multiple of the row tile (no whole-array fallback).
    rows = pl.cdiv(total, _LANES)
    if rows <= _MAX_TILE_ROWS:
        tile_rows = rows            # block 2nd-to-last dim == full dim: OK
    else:
        tile_rows = _MAX_TILE_ROWS  # multiple of 8
        rows = pl.cdiv(rows, tile_rows) * tile_rows
    padded_total = rows * _LANES

    if padded_total != total:
        flat = jnp.pad(flat, (0, padded_total - total))
    x2 = flat.reshape(rows, _LANES)

    grid = (rows // tile_rows,)

    out2 = pl.pallas_call(
        _lambda_kernel,
        out_shape=jax.ShapeDtypeStruct((rows, _LANES), x.dtype),
        grid=grid,
        in_specs=[pl.BlockSpec((tile_rows, _LANES), lambda i: (i, 0))],
        out_specs=pl.BlockSpec((tile_rows, _LANES), lambda i: (i, 0)),
        compiler_params=pltpu.CompilerParams(
            dimension_semantics=("parallel",),
            vmem_limit_bytes=32 * 1024 * 1024,
        ),
    )(x2)

    out_flat = out2.reshape(-1)
    if padded_total != total:
        out_flat = out_flat[:total]
    return out_flat.reshape(orig_shape)


if __name__ == "__main__":
    key = jax.random.PRNGKey(0)
    # Small NCHW input consistent with a conv-net feature map.
    x = jax.random.normal(key, (2, 4, 16, 16), dtype=jnp.float32)

    y = lambda_layer(x)
    y = jax.block_until_ready(y)

    # Reference: forward(x) = lambd(x) (identity lambda).
    ref = _lambda_fn(x)
    assert y.shape == x.shape and y.dtype == x.dtype
    assert bool(jnp.allclose(y, ref, atol=0.0, rtol=0.0))

    print("KERNEL_OK")
</pallas_src>

<mosaic_0001>
module attributes {stable_mosaic.version = 11 : i64} {
  func.func @_lambda_kernel(%arg0: i32, %arg1: memref<2x1024xf32, #tpu.memory_space<vmem>>, %arg2: memref<2x1024xf32, #tpu.memory_space<vmem>>) attributes {dimension_semantics = [#tpu.dimension_semantics<parallel>], iteration_bounds = array<i64: 1>, scalar_prefetch = 0 : i64, scratch_operands = 0 : i64, tpu.core_type = #tpu.core_type<tc>, window_params = [{transform_indices = @transform_0, window_bounds = array<i64: 2, 1024>}, {transform_indices = @transform_1, window_bounds = array<i64: 2, 1024>}]} {
    %c0 = arith.constant 0 : index
    %c0_0 = arith.constant 0 : index
    %0 = vector.load %arg1[%c0, %c0_0] : memref<2x1024xf32, #tpu.memory_space<vmem>>, vector<2x1024xf32>
    %c0_1 = arith.constant 0 : index
    %c0_2 = arith.constant 0 : index
    %1 = vector.load %arg2[%c0_1, %c0_2] : memref<2x1024xf32, #tpu.memory_space<vmem>>, vector<2x1024xf32>
    tpu.vector_store %arg2[%c0_1, %c0_2], %0 {strides = array<i32>} : memref<2x1024xf32, #tpu.memory_space<vmem>>, vector<2x1024xf32>,
    return
  }
  func.func @transform_0(%arg0: i32) -> (i32, i32) {
    %c0_i32 = arith.constant 0 : i32
    %c0_i32_0 = arith.constant 0 : i32
    return %arg0, %c0_i32 : i32, i32
  }
  func.func @transform_1(%arg0: i32) -> (i32, i32) {
    %c0_i32 = arith.constant 0 : i32
    %c0_i32_0 = arith.constant 0 : i32
    return %arg0, %c0_i32 : i32, i32
  }
}

</mosaic_0001>

<bundles_post_ra>
// kernel: tpu_custom_call.1
= control target key start
LH: loop header
LB: loop body
LE: loop exit
PB: predicated region body
PF: predicated region fallthrough
CT: control target
= control target key end

     0   :  { %6 = vsyncpa [#allocation3], 0  ;;  %s116_s0 = inlined_call_operand.hbm [shape: f32[2,1024], index: 0, kind: input, shape index: {}]   ;;  %s117_s1 = inlined_call_operand.hbm [shape: f32[2,1024], index: 1, kind: output, shape index: {}]  }
   0x1   :  { %7 = vsyncpa [#allocation4], 0  ;;  %s13_s8 = sshll.u32 %s116_s0, 4  ;;  %s98_s9 = smov [#allocation2]   ;;  %s14_s8 = int_to_ptr.hbm [resolvable:$true] %s13_s8 }
   0x2   :  { %s15_s10 = sshll.u32 %s98_s9, 4  ;;  %s16_s10 = int_to_ptr.vmem [resolvable:$true] %s15_s10 }
   0x3   :  { %18 = dma.hbm_to_vmem [thread:$0]  %s14_s8, 256, %s16_s10, [#allocation3]  }
   0x4   :  { %94 = dma.done.wait [#allocation3], 256  }
   0x5   :  { %95 = vsyncadd [#allocation3], 4294967040  ;;  %s99_s11 = smov [#allocation5]   ;;  %s34_s15 = sshll.u32 %s117_s1, 4  ;;  %v23_v0 = vld [vmem:[#allocation2] sm:$0xff]  ;;  %v24_v1 = vld [vmem:[#allocation2 + $0x8] sm:$0xff]  ;;  %s35_s15 = int_to_ptr.hbm [resolvable:$true] %s34_s15 }
   0x6   :  { %s32_s12 = sshll.u32 %s99_s11, 4  ;;  %25 = vst [vmem:[#allocation5] sm:$0xff] %v23_v0  ;;  %s33_s12 = int_to_ptr.vmem [resolvable:$true] %s32_s12 }
   0x7   :  { %26 = vst [vmem:[#allocation5 + $0x8] sm:$0xff] %v24_v1 }
   0x8   :  { %37 = dma.vmem_to_hbm [thread:$0]  %s33_s12, 256, %s35_s15, [#allocation4]  }
   0x9   :  { %96 = dma.done.wait [#allocation4], 256  }
   0xa   :  { %97 = vsyncadd [#allocation4], 4294967040 }
   0xb   :  { %42 = vsyncpa [#allocation3], 1 }
   0xc   :  { %43 = vsyncpa [#allocation4], 1 }

</bundles_post_ra>
